<compile_context>
chip_gen: v7x
topology: tpu7x:2x2x1
jax: 0.10.0
libtpu: 0.0.40
codegen_flags: <defaults>
</compile_context>

<pallas_src>
import functools

import jax
import jax.numpy as jnp
from jax import lax
from jax.experimental import pallas as pl
from jax.experimental.pallas import tpu as pltpu


def _softpool_kernel(d_ref, o_ref, m_ref, s_ref, num_ref, *,
                     inv_temp, t_total, needs_t_mask):
    """Process one (bt, tt, tc) tile of `decision`; online softmax over time."""
    kt = pl.program_id(2)
    nk = pl.num_programs(2)

    @pl.when(kt == 0)
    def _():
        m_ref[...] = jnp.full_like(m_ref, -jnp.inf)
        s_ref[...] = jnp.zeros_like(s_ref)
        num_ref[...] = jnp.zeros_like(num_ref)

    d = d_ref[...].astype(jnp.float32)                      # (bt, tt, tc)
    bt, tt, tc = d.shape

    # Softmax argument; temperature folded in statically (skipped when T == 1).
    x = d * inv_temp if inv_temp != 1.0 else d

    def update(x_in, d_in):
        m_prev = m_ref[...]                                 # (bt, tc)
        m_new = jnp.maximum(m_prev, jnp.max(x_in, axis=1))  # running max
        alpha = jnp.exp(m_prev - m_new)                     # rescale old partials
        e = jnp.exp(x_in - m_new[:, None, :])               # (bt, tt, tc)
        s_ref[...] = alpha * s_ref[...] + jnp.sum(e, axis=1)            # denom
        num_ref[...] = alpha * num_ref[...] + jnp.sum(d_in * e, axis=1)  # sum(d*e)
        m_ref[...] = m_new

    if needs_t_mask:
        # Mask is applied ONLY on the last (partial) time tile; all other
        # tiles take the unmasked fast path (no iota / where on them).
        @pl.when(kt < nk - 1)
        def _():
            update(x, d)

        @pl.when(kt == nk - 1)
        def _():
            # (1, tt, 1) iota broadcast in the compare -- no full-tile int32.
            t_rel = lax.broadcasted_iota(jnp.int32, (1, tt, 1), 1)
            valid = t_rel < (t_total - kt * tt)
            # x -> -inf so padded slots can't corrupt the running max;
            # d -> 0 so unspecified HBM data can't leak NaN/Inf into d * e.
            update(jnp.where(valid, x, -jnp.inf), jnp.where(valid, d, 0.0))
    else:
        update(x, d)

    @pl.when(kt == nk - 1)
    def _():
        # Exact finalize: out = num / s.  Runs once per (batch, channel)
        # block on a single (bt, tc) vector -- nowhere near the critical
        # path, so no approximate reciprocal (it caused ~2e-3 error).
        o_ref[...] = (num_ref[...] / s_ref[...]).astype(o_ref.dtype)


def _choose_blocks(B, T, C, itemsize, target_block_bytes=8 << 20):
    """Pick (bt, tt, tc) so one input block approaches the byte target."""
    # Channel tile: full C, unless batch gives only one "parallel" block and
    # C can be split into >=2 lane-aligned (multiple-of-128) tiles; channels
    # are fully independent in SoftPool, so this safely feeds both v7x TCs.
    if B <= 8 and C >= 256 and C % 128 == 0:
        tc = max(128, (C // 2) // 128 * 128)
    else:
        tc = C

    # Batch tile: full B if small; otherwise a multiple of 8 sized so a block
    # with the FULL time axis approaches the byte target, while keeping at
    # least 2 batch blocks for megacore when B allows it.
    if B <= 8:
        bt = B
    else:
        row_bytes = T * tc * itemsize            # one batch row, full time axis
        bt = max(8, min(B // 2, target_block_bytes // max(1, row_bytes)) // 8 * 8)

    # Time tile: full T if the (bt, T, tc) block fits the byte target, else
    # the largest multiple of 8 that does (only now do we shrink tt).
    block_row_bytes = bt * tc * itemsize
    max_tt = max(8, (target_block_bytes // max(1, block_row_bytes)) // 8 * 8)
    tt = T if T <= max_tt else max_tt
    return bt, tt, tc


def softpool(logits, decision, T=1.0, pooldim=1, target_block_bytes=8 << 20):
    """Pallas SoftPool; `logits` is unused (matches the reference module)."""
    del logits  # not used by the reference forward pass
    assert pooldim == 1, "kernel implemented for pooldim=1 (time axis)"
    B, Tt, C = decision.shape
    itemsize = jnp.dtype(decision.dtype).itemsize
    bt, tt, tc = _choose_blocks(B, Tt, C, itemsize, target_block_bytes)

    grid = (pl.cdiv(B, bt), pl.cdiv(C, tc), pl.cdiv(Tt, tt))
    kernel = functools.partial(
        _softpool_kernel,
        inv_temp=float(1.0 / T),          # plain Python float, no captured consts
        t_total=Tt,
        needs_t_mask=(Tt % tt) != 0,
    )

    # Explicit scoped-VMEM budget derived from the actual block sizes
    # (double-buffered input + output + f32 accumulators + margin), capped at
    # 48 MiB so it stays under v7x's 64 MiB physical VMEM per TensorCore.
    in_block_bytes = bt * tt * tc * itemsize
    out_block_bytes = bt * tc * itemsize
    needed = 2 * in_block_bytes + 2 * out_block_bytes + 3 * bt * tc * 4 + (1 << 20)
    vmem_limit = int(min(48 << 20, max(needed, 32 << 20)))

    # NOTE: when B % bt != 0 the padded batch rows read unspecified HBM data
    # and may compute NaN/Inf; rows are independent and the padded output
    # rows are dropped on writeback, so this stays confined to discarded rows.
    # TODO(synk): for C < 128 a lane-dense relayout (e.g. (T, B*C) with time
    # on sublanes) should come from the upstream producer; transposing here
    # would add a full extra HBM pass on this memory-bound kernel.
    return pl.pallas_call(
        kernel,
        out_shape=jax.ShapeDtypeStruct((B, C), decision.dtype),
        grid=grid,
        in_specs=[pl.BlockSpec((bt, tt, tc), lambda b, c, k: (b, k, c))],
        out_specs=pl.BlockSpec((bt, tc), lambda b, c, k: (b, c)),
        scratch_shapes=[
            pltpu.VMEM((bt, tc), jnp.float32),   # running max  m
            pltpu.VMEM((bt, tc), jnp.float32),   # running sum  s (softmax denom)
            pltpu.VMEM((bt, tc), jnp.float32),   # running sum  of d * e
        ],
        compiler_params=pltpu.CompilerParams(
            dimension_semantics=("parallel", "parallel", "arbitrary"),
            vmem_limit_bytes=vmem_limit,
        ),
    )(decision)


def softpool_ref(decision, T=1.0, pooldim=1):
    w = jax.nn.softmax(decision / T, axis=pooldim)
    return jnp.sum(decision * w, axis=pooldim)


def _check(out, ref, name):
    out = jax.block_until_ready(out)
    err = float(jnp.max(jnp.abs(out - ref)))
    assert out.shape == ref.shape, (name, out.shape, ref.shape)
    assert jnp.allclose(out, ref, atol=1e-5, rtol=1e-5), (name, err)


if __name__ == "__main__":
    key = jax.random.PRNGKey(0)

    # 1) Small shape matching the module's typical use (single tile, fast path).
    k1, k2 = jax.random.split(key)
    B, Tt, C = 2, 8, 32
    logits = jax.random.normal(k1, (B, Tt, C), dtype=jnp.float32)
    decision = jax.random.uniform(k2, (B, Tt, C), dtype=jnp.float32)
    out = softpool(logits, decision, T=1.0, pooldim=1)
    _check(out, softpool_ref(decision, T=1.0, pooldim=1), "base")

    # 2) Force time tiling + last-tile tail mask (tiny block-byte target).
    k3, k4 = jax.random.split(k2)
    decision2 = jax.random.uniform(k3, (2, 20, 32), dtype=jnp.float32)
    out2 = softpool(None, decision2, T=1.0, pooldim=1, target_block_bytes=2048)
    _check(out2, softpool_ref(decision2, T=1.0, pooldim=1), "tail_mask")

    # 3) Partial batch block (B % 8 != 0) and non-unit temperature.
    decision3 = jax.random.uniform(k4, (10, 16, 32), dtype=jnp.float32)
    out3 = softpool(None, decision3, T=2.0, pooldim=1)
    _check(out3, softpool_ref(decision3, T=2.0, pooldim=1), "partial_batch")

    # 4) Channel-split parallel axis (small B, C >= 256).
    decision4 = jax.random.uniform(jax.random.PRNGKey(7), (2, 8, 256),
                                   dtype=jnp.float32)
    out4 = softpool(None, decision4, T=1.0, pooldim=1)
    _check(out4, softpool_ref(decision4, T=1.0, pooldim=1), "channel_split")

    print("KERNEL_OK")
</pallas_src>

<mosaic_0001>
module attributes {stable_mosaic.version = 11 : i64} {
  func.func @_softpool_kernel(%arg0: i32, %arg1: i32, %arg2: i32, %arg3: memref<2x8x32xf32, #tpu.memory_space<vmem>>, %arg4: memref<2x32xf32, #tpu.memory_space<vmem>>, %arg5: memref<2x32xf32, #tpu.memory_space<vmem>>, %arg6: memref<2x32xf32, #tpu.memory_space<vmem>>, %arg7: memref<2x32xf32, #tpu.memory_space<vmem>>) attributes {dimension_semantics = [#tpu.dimension_semantics<parallel>, #tpu.dimension_semantics<parallel>, #tpu.dimension_semantics<arbitrary>], iteration_bounds = array<i64: 1, 1, 1>, scalar_prefetch = 0 : i64, scratch_operands = 3 : i64, tpu.core_type = #tpu.core_type<tc>, window_params = [{transform_indices = @transform_0, window_bounds = array<i64: 2, 8, 32>}, {transform_indices = @transform_1, window_bounds = array<i64: 2, 32>}]} {
    %c0_i32 = arith.constant 0 : i32
    %0 = arith.cmpi eq, %arg2, %c0_i32 : i32
    %1 = arith.extui %0 : i1 to i32
    %c0_i32_0 = arith.constant 0 : i32
    %2 = arith.cmpi ne, %1, %c0_i32_0 : i32
    scf.if %2 {
      %cst_19 = arith.constant 0xFF800000 : f32
      %28 = vector.broadcast %cst_19 : f32 to vector<2x32xf32>
      %c0_20 = arith.constant 0 : index
      %c0_21 = arith.constant 0 : index
      %29 = vector.load %arg5[%c0_20, %c0_21] : memref<2x32xf32, #tpu.memory_space<vmem>>, vector<2x32xf32>
      tpu.vector_store %arg5[%c0_20, %c0_21], %28 {strides = array<i32>} : memref<2x32xf32, #tpu.memory_space<vmem>>, vector<2x32xf32>,
      %cst_22 = arith.constant 0.000000e+00 : f32
      %30 = vector.broadcast %cst_22 : f32 to vector<2x32xf32>
      %c0_23 = arith.constant 0 : index
      %c0_24 = arith.constant 0 : index
      %31 = vector.load %arg6[%c0_23, %c0_24] : memref<2x32xf32, #tpu.memory_space<vmem>>, vector<2x32xf32>
      tpu.vector_store %arg6[%c0_23, %c0_24], %30 {strides = array<i32>} : memref<2x32xf32, #tpu.memory_space<vmem>>, vector<2x32xf32>,
      %cst_25 = arith.constant 0.000000e+00 : f32
      %32 = vector.broadcast %cst_25 : f32 to vector<2x32xf32>
      %c0_26 = arith.constant 0 : index
      %c0_27 = arith.constant 0 : index
      %33 = vector.load %arg7[%c0_26, %c0_27] : memref<2x32xf32, #tpu.memory_space<vmem>>, vector<2x32xf32>
      tpu.vector_store %arg7[%c0_26, %c0_27], %32 {strides = array<i32>} : memref<2x32xf32, #tpu.memory_space<vmem>>, vector<2x32xf32>,
    } else {
    }
    %c0 = arith.constant 0 : index
    %c0_1 = arith.constant 0 : index
    %c0_2 = arith.constant 0 : index
    %3 = vector.load %arg3[%c0, %c0_1, %c0_2] : memref<2x8x32xf32, #tpu.memory_space<vmem>>, vector<2x8x32xf32>
    %c0_3 = arith.constant 0 : index
    %c0_4 = arith.constant 0 : index
    %4 = vector.load %arg5[%c0_3, %c0_4] : memref<2x32xf32, #tpu.memory_space<vmem>>, vector<2x32xf32>
    %cst = arith.constant dense<0xFF800000> : vector<2x32xf32>
    %5 = vector.multi_reduction <maximumf>, %3, %cst [1] : vector<2x8x32xf32> to vector<2x32xf32>
    %6 = arith.maximumf %4, %5 : vector<2x32xf32>
    %7 = arith.subf %4, %6 : vector<2x32xf32>
    %8 = math.exp %7 : vector<2x32xf32>
    %9 = vector.shape_cast %6 : vector<2x32xf32> to vector<2x1x32xf32>
    %10 = vector.broadcast %9 : vector<2x1x32xf32> to vector<2x8x32xf32>
    %11 = arith.subf %3, %10 : vector<2x8x32xf32>
    %12 = math.exp %11 : vector<2x8x32xf32>
    %c0_5 = arith.constant 0 : index
    %c0_6 = arith.constant 0 : index
    %13 = vector.load %arg6[%c0_5, %c0_6] : memref<2x32xf32, #tpu.memory_space<vmem>>, vector<2x32xf32>
    %14 = arith.mulf %8, %13 : vector<2x32xf32>
    %cst_7 = arith.constant dense<0.000000e+00> : vector<2x32xf32>
    %15 = vector.multi_reduction <add>, %12, %cst_7 [1] : vector<2x8x32xf32> to vector<2x32xf32>
    %16 = arith.addf %14, %15 : vector<2x32xf32>
    %c0_8 = arith.constant 0 : index
    %c0_9 = arith.constant 0 : index
    %17 = vector.load %arg6[%c0_8, %c0_9] : memref<2x32xf32, #tpu.memory_space<vmem>>, vector<2x32xf32>
    tpu.vector_store %arg6[%c0_8, %c0_9], %16 {strides = array<i32>} : memref<2x32xf32, #tpu.memory_space<vmem>>, vector<2x32xf32>,
    %c0_10 = arith.constant 0 : index
    %c0_11 = arith.constant 0 : index
    %18 = vector.load %arg7[%c0_10, %c0_11] : memref<2x32xf32, #tpu.memory_space<vmem>>, vector<2x32xf32>
    %19 = arith.mulf %8, %18 : vector<2x32xf32>
    %20 = arith.mulf %3, %12 : vector<2x8x32xf32>
    %cst_12 = arith.constant dense<0.000000e+00> : vector<2x32xf32>
    %21 = vector.multi_reduction <add>, %20, %cst_12 [1] : vector<2x8x32xf32> to vector<2x32xf32>
    %22 = arith.addf %19, %21 : vector<2x32xf32>
    %c0_13 = arith.constant 0 : index
    %c0_14 = arith.constant 0 : index
    %23 = vector.load %arg7[%c0_13, %c0_14] : memref<2x32xf32, #tpu.memory_space<vmem>>, vector<2x32xf32>
    tpu.vector_store %arg7[%c0_13, %c0_14], %22 {strides = array<i32>} : memref<2x32xf32, #tpu.memory_space<vmem>>, vector<2x32xf32>,
    %c0_15 = arith.constant 0 : index
    %c0_16 = arith.constant 0 : index
    %24 = vector.load %arg5[%c0_15, %c0_16] : memref<2x32xf32, #tpu.memory_space<vmem>>, vector<2x32xf32>
    tpu.vector_store %arg5[%c0_15, %c0_16], %6 {strides = array<i32>} : memref<2x32xf32, #tpu.memory_space<vmem>>, vector<2x32xf32>,
    %c0_i32_17 = arith.constant 0 : i32
    %25 = arith.cmpi eq, %arg2, %c0_i32_17 : i32
    %26 = arith.extui %25 : i1 to i32
    %c0_i32_18 = arith.constant 0 : i32
    %27 = arith.cmpi ne, %26, %c0_i32_18 : i32
    scf.if %27 {
      %c0_19 = arith.constant 0 : index
      %c0_20 = arith.constant 0 : index
      %28 = vector.load %arg7[%c0_19, %c0_20] : memref<2x32xf32, #tpu.memory_space<vmem>>, vector<2x32xf32>
      %c0_21 = arith.constant 0 : index
      %c0_22 = arith.constant 0 : index
      %29 = vector.load %arg6[%c0_21, %c0_22] : memref<2x32xf32, #tpu.memory_space<vmem>>, vector<2x32xf32>
      %30 = arith.divf %28, %29 : vector<2x32xf32>
      %c0_23 = arith.constant 0 : index
      %c0_24 = arith.constant 0 : index
      %31 = vector.load %arg4[%c0_23, %c0_24] : memref<2x32xf32, #tpu.memory_space<vmem>>, vector<2x32xf32>
      tpu.vector_store %arg4[%c0_23, %c0_24], %30 {strides = array<i32>} : memref<2x32xf32, #tpu.memory_space<vmem>>, vector<2x32xf32>,
    } else {
    }
    return
  }
  func.func @transform_0(%arg0: i32, %arg1: i32, %arg2: i32) -> (i32, i32, i32) {
    %c0_i32 = arith.constant 0 : i32
    return %arg0, %arg2, %arg1 : i32, i32, i32
  }
  func.func @transform_1(%arg0: i32, %arg1: i32, %arg2: i32) -> (i32, i32) {
    %c0_i32 = arith.constant 0 : i32
    return %arg0, %arg1 : i32, i32
  }
}

</mosaic_0001>

<bundles_post_ra>
// kernel: tpu_custom_call.1
= control target key start
LH: loop header
LB: loop body
LE: loop exit
PB: predicated region body
PF: predicated region fallthrough
CT: control target
= control target key end

     0   :  { %6 = vsyncpa [#allocation6], 0  ;;  %s288_s0 = inlined_call_operand.hbm [shape: f32[2,8,32], index: 0, kind: input, shape index: {}]   ;;  %s289_s1 = inlined_call_operand.hbm [shape: f32[2,32], index: 1, kind: output, shape index: {}]  }
   0x1   :  { %7 = vsyncpa [#allocation7], 0  ;;  %s231_s6 = smov [#allocation5]   ;;  %s183_s10 = scalar_lea.hbm %s288_s0, 256 }
   0x2   :  { %s13_s7 = sshll.u32 %s231_s6, 4  ;;  %p184_p0 = scmp.ne.s32.totalorder %s288_s0, %s183_s10  ;;  %s14_s7 = int_to_ptr.vmem [resolvable:$true] %s13_s7 }
   0x3   :  { %p187_p1 = scmp.lt.u32.totalorder %s183_s10, %s288_s0 }
   0x5   :  { %p189_p2 = pnand %p187_p1, %p184_p0 }
   0x7   :  { %192 = shalt.err (!%p189_p2)
}
   0x8   :  { %s193_s15 = scalar_lea.vmem %s14_s7, 256  ;;  %p198_p4 = scmp.lt.s32.totalorder %s14_s7, %s14_s7 }
   0x9   :  { %p194_p3 = scmp.ne.s32.totalorder %s14_s7, %s193_s15  ;;  %p199_p5 = scmp.lt.s32.totalorder %s193_s15, %s193_s15 }
   0xb   :  { %p200_p6 = por %p199_p5, %p198_p4 }
   0xd   :  { %p201_p7 = pnand %p200_p6, %p194_p3 }
   0xf   :  { %204 = shalt.err (!%p201_p7)
}
  0x10   :  { %s232_s16 = smov 128   ;;  %s233_s17 = smov 8  }
  0x11   :  { %19 = dma.hbm_to_vmem [thread:$0]  %s288_s0, 256, %s14_s7, [#allocation6], %s232_s16, %s232_s16, %s233_s17  }
  0x12   :  { %227 = dma.done.wait [#allocation6], 256  }
  0x13   :  { %228 = vsyncadd [#allocation6], 4294967040  ;;  %vm27_vm0 = vcmask 254976   ;;  %v234_v0 = vmov -inf   ;;  %v235_v1 = vmov 0.0   ;;  %vm34_vm1 = vcmask 261120  }
  0x14   :  { %28 = vst.msk [vmem:[#allocation2] sm:$0x3] %vm27_vm0, %v234_v0  ;;  %29 = vst.msk [vmem:[#allocation3] sm:$0x3] %vm27_vm0, %v235_v1  ;;  %v31_v2 = vld [vmem:[#allocation5] sm:$0xff]  ;;  %v32_v3 = vld [vmem:[#allocation5 + $0x8] sm:$0xff]  ;;  %v62_v12 = vlaneseq }
  0x15   :  { %30 = vst.msk [vmem:[#allocation4] sm:$0x3] %vm27_vm0, %v235_v1  ;;  %v35_v4 = vsel %vm34_vm1, %v31_v2, -inf  ;;  %v42_v5 = vsel %vm34_vm1, %v32_v3, -inf  ;;  %v236_v10 = vmov 1966171168  }
  0x16   :  { %v36_v6 = vrot.slane %v35_v4, 4  ;;  %v43_v7 = vrot.slane %v42_v5, 4  ;;  %v60_v11 = vunpack.c.l.s4 %v236_v10  ;;  %v63_v18 = vshrl.u32 %v62_v12, 7  ;;  %s237_s0 = smov [#allocation8]  }
  0x17   :  { %vm51_vm2 = vcmask 1041409   ;;  %s159_s20 = sshll.u32 %s237_s0, 4  ;;  %s160_s20 = int_to_ptr.vmem [resolvable:$true] %s159_s20 }
  0x18   :  { %v37_v8 = vmax.f32 %v35_v4, %v36_v6  ;;  %v44_v9 = vmax.f32 %v42_v5, %v43_v7  ;;  %v61_v17 = vunpack.c.0.s8 %v60_v11  ;;  %v83_v28 = vsub.s32 0, %v63_v18  ;;  %s205_s21 = scalar_lea.vmem %s160_s20, 32  ;;  %p210_p9 = scmp.lt.s32.totalorder %s160_s20, %s160_s20 }
  0x19   :  { %p206_p8 = scmp.ne.s32.totalorder %s160_s20, %s205_s21  ;;  %p211_p10 = scmp.lt.s32.totalorder %s205_s21, %s205_s21 }
  0x1a   :  { %v38_v13 = vrot.slane %v37_v8, 2  ;;  %v45_v14 = vrot.slane %v44_v9, 2  ;;  %v64_v24 = vsub.s32 %v61_v17, %v63_v18 }
  0x1b   :  { %v33_v21 = vld [vmem:[#allocation2] sm:$0x3]  ;;  %v97_v1 = vld [vmem:[#allocation3] sm:$0x3]  ;;  %p212_p11 = por %p211_p10, %p210_p9 }
  0x1c   :  { %v39_v15 = vmax.f32 %v37_v8, %v38_v13  ;;  %v46_v16 = vmax.f32 %v44_v9, %v45_v14  ;;  %v120_v7 = vld [vmem:[#allocation4] sm:$0x3] }
  0x1d   :  { %p213_p12 = pnand %p212_p11, %p206_p8 }
  0x1e   :  { %v40_v19 = vrot.slane %v39_v15, 1  ;;  %v47_v20 = vrot.slane %v46_v16, 1 }
  0x20   :  { %v41_v22 = vmax.f32 %v39_v15, %v40_v19  ;;  %v48_v23 = vmax.f32 %v46_v16, %v47_v20 }
  0x22   :  { %v52_v25 = vsel %vm51_vm2, %v48_v23, %v41_v22 }
  0x23   :  { %v54_v26 = vmax.f32 %v33_v21, %v52_v25 }
  0x25   :  { %v65_v27 = vrot.slane %v54_v26, %v64_v24  ;;  %144 = vst.msk [vmem:[#allocation2] sm:$0x3] %vm27_vm0, %v54_v26  ;;  %v55_v38 = vsub.f32 %v33_v21, %v54_v26 }
  0x27   :  { %v66_v29 = vcombine.high %v65_v27, %v65_v27  ;;  %v73_v30 = vrot.slane %v65_v27, %v64_v24  ;;  %v56_v39 = vmul.f32 1.442695, %v55_v38 }
  0x29   :  { %v80_v31 = vrot.slane %v66_v29, %v64_v24  ;;  %v84_v32 = vrot.slane %v73_v30, %v83_v28 }
  0x2b   :  { %v88_v33 = vrot.slane %v80_v31, %v83_v28  ;;  %v91_v34 = vsub.f32 %v31_v2, %v84_v32 }
  0x2d   :  { %v92_v35 = vsub.f32 %v32_v3, %v88_v33  ;;  %v93_v36 = vmul.f32 1.442695, %v91_v34 }
  0x2f   :  { %175 = vpow2.f32 %v93_v36  ;;  %v95_v37 = vmul.f32 1.442695, %v92_v35 }
  0x31   :  { %177 = vpow2.f32 %v95_v37 }
  0x32   :  { %179 = vpow2.f32 %v56_v39 }
  0x39   :  { %v176_v40 = vpop.eup %175 }
  0x3a   :  { %v99_v41 = vsel %vm34_vm1, %v176_v40, 0.0  ;;  %v122_v42 = vmul.f32 %v176_v40, %v31_v2 }
  0x3b   :  { %v178_v43 = vpop.eup %177  ;;  %v100_v44 = vrot.slane %v99_v41, 4 }
  0x3c   :  { %v106_v45 = vsel %vm34_vm1, %v178_v43, 0.0  ;;  %v123_v46 = vmul.f32 %v178_v43, %v32_v3  ;;  %v124_v47 = vsel %vm34_vm1, %v122_v42, 0.0  ;;  %v180_v0 = vpop.eup %179 }
  0x3d   :  { %v101_v48 = vadd.f32 %v100_v44, %v99_v41  ;;  %v107_v49 = vrot.slane %v106_v45, 4  ;;  %v125_v50 = vrot.slane %v124_v47, 4  ;;  %v98_v9 = vmul.f32 %v180_v0, %v97_v1 }
  0x3e   :  { %v131_v51 = vsel %vm34_vm1, %v123_v46, 0.0  ;;  %v121_v14 = vmul.f32 %v180_v0, %v120_v7 }
  0x3f   :  { %v102_v52 = vrot.slane %v101_v48, 2  ;;  %v108_v53 = vadd.f32 %v107_v49, %v106_v45  ;;  %v126_v54 = vadd.f32 %v125_v50, %v124_v47  ;;  %v132_v55 = vrot.slane %v131_v51, 4 }
  0x41   :  { %v103_v56 = vadd.f32 %v102_v52, %v101_v48  ;;  %v109_v57 = vrot.slane %v108_v53, 2  ;;  %v127_v58 = vrot.slane %v126_v54, 2  ;;  %v133_v59 = vadd.f32 %v132_v55, %v131_v51 }
  0x43   :  { %v104_v60 = vrot.slane %v103_v56, 1  ;;  %v110_v61 = vadd.f32 %v109_v57, %v108_v53  ;;  %v128_v62 = vadd.f32 %v127_v58, %v126_v54  ;;  %v134_v63 = vrot.slane %v133_v59, 2 }
  0x45   :  { %v111_v2 = vrot.slane %v110_v61, 1  ;;  %v129_v3 = vrot.slane %v128_v62, 1  ;;  %v135_v4 = vadd.f32 %v134_v63, %v133_v59  ;;  %v105_v5 = vadd.f32 %v104_v60, %v103_v56 }
  0x47   :  { %v112_v6 = vadd.f32 %v111_v2, %v110_v61  ;;  %v136_v8 = vrot.slane %v135_v4, 1  ;;  %v130_v11 = vadd.f32 %v129_v3, %v128_v62 }
  0x49   :  { %v115_v10 = vsel %vm51_vm2, %v112_v6, %v105_v5  ;;  %v137_v12 = vadd.f32 %v136_v8, %v135_v4 }
  0x4a   :  { %v117_v13 = vadd.f32 %v115_v10, %v98_v9 }
  0x4b   :  { %v140_v15 = vsel %vm51_vm2, %v137_v12, %v130_v11 }
  0x4c   :  { %119 = vst.msk [vmem:[#allocation3] sm:$0x3] %vm27_vm0, %v117_v13  ;;  %v142_v16 = vadd.f32 %v140_v15, %v121_v14 }
  0x4e   :  { %143 = vst.msk [vmem:[#allocation4] sm:$0x3] %vm27_vm0, %v142_v16 }
  0x53   :  { %v149_v17 = vld [vmem:[#allocation3] sm:$0x3] }
  0x54   :  { %181 = vrcp.f32 %v149_v17 }
  0x55   :  { %v148_v19 = vld [vmem:[#allocation4] sm:$0x3] }
  0x5e   :  { %v182_v18 = vpop.eup %181 }
  0x5f   :  { %v151_v20 = vmul.f32 %v182_v18, %v148_v19 }
  0x61   :  { %152 = vst.msk [vmem:[#allocation8] sm:$0x3] %vm27_vm0, %v151_v20 }
  0x62   :  { %216 = shalt.err (!%p213_p12)
}
  0x63   :  { %s217_s24 = scalar_lea.hbm %s289_s1, 32 }
  0x64   :  { %p218_p13 = scmp.ne.s32.totalorder %s289_s1, %s217_s24  ;;  %p221_p0 = scmp.lt.u32.totalorder %s217_s24, %s289_s1 }
  0x66   :  { %p223_p1 = pnand %p221_p0, %p218_p13 }
  0x68   :  { %226 = shalt.err (!%p223_p1)
}
  0x69   :  { %162 = dma.vmem_to_hbm [thread:$0]  %s160_s20, 32, %s289_s1, [#allocation7]  }
  0x6a   :  { %229 = dma.done.wait [#allocation7], 32  }
  0x6b   :  { %230 = vsyncadd [#allocation7], 4294967264 }
  0x6c   :  { %166 = vsyncpa [#allocation6], 1 }
  0x6d   :  { %167 = vsyncpa [#allocation7], 1 }

</bundles_post_ra>
